<compile_context>
chip_gen: v7x
topology: tpu7x:2x2x1
jax: 0.10.0
libtpu: 0.0.40
codegen_flags: <defaults>
</compile_context>

<pallas_src>
import math
from functools import lru_cache

import jax
import jax.numpy as jnp
from jax.experimental import pallas as pl
from jax.experimental.pallas import tpu as pltpu


def _sgn_kernel(x_ref, a_ref, wr_ref, wi_ref, binv_ref, o_ref):
    mp = wr_ref.shape[0]
    x = x_ref[...].astype(jnp.bfloat16)                                  # (N, TL)
    # forward rfft2 (ortho): [Xr; Xi] = [Ar; Ai] @ x  -- one MXU matmul
    xri = jnp.dot(a_ref[...], x, preferred_element_type=jnp.float32)    # (2Mp, TL)
    xr = xri[:mp]
    xi = xri[mp:]
    # spectral gating (f32 on the VPU): Y = X * W  (elementwise complex)
    wr = wr_ref[...]
    wi = wi_ref[...]
    yr = xr * wr - xi * wi
    yi = xr * wi + xi * wr
    yri = jnp.concatenate([yr, yi], axis=0).astype(jnp.bfloat16)         # (2Mp, TL)
    # inverse rfft2 (ortho, Hermitian fold baked into Binv): one MXU matmul
    out = jnp.dot(binv_ref[...], yri, preferred_element_type=jnp.float32)  # (N, TL)
    o_ref[...] = out.astype(o_ref.dtype)


@lru_cache(maxsize=None)
def _dft_operators(a, b):
    """Merged bf16 real-DFT operators (ortho) for an (a, b) spatial grid.

    Returns (A, Binv, Mp):
      A    : (2*Mp, a*b)  rows = [Re forward rfft2 ; Im forward rfft2]
      Binv : (a*b, 2*Mp)  cols = [Re inverse fold  | Im inverse fold]
      Mp   : a*(b//2+1) padded up to a multiple of 8 (zero rows/cols).
    """
    wf = b // 2 + 1
    M = a * wf
    Mp = ((M + 7) // 8) * 8

    m = jnp.arange(a, dtype=jnp.float32)
    n = jnp.arange(b, dtype=jnp.float32)
    u = jnp.arange(a, dtype=jnp.float32)
    v = jnp.arange(wf, dtype=jnp.float32)
    scale = 1.0 / math.sqrt(a * b)

    # forward: X[u,v] = scale * sum_{m,n} x[m,n] * exp(-2*pi*i*(u*m/a + v*n/b))
    phase_f = -2.0 * math.pi * (
        u[:, None, None, None] * m[None, None, :, None] / a
        + v[None, :, None, None] * n[None, None, None, :] / b)
    ar = (scale * jnp.cos(phase_f)).reshape(M, a * b)
    ai = (scale * jnp.sin(phase_f)).reshape(M, a * b)

    # inverse: out[m,n] = scale * sum_{u,v<wf} c_v * Re(Y[u,v]*exp(+2*pi*i*(...)))
    # c_v folds the Hermitian-mirrored frequencies (DC / Nyquist counted once).
    cv = jnp.where(
        v == 0, 1.0,
        jnp.where(jnp.logical_and(b % 2 == 0, v == b // 2), 1.0, 2.0))
    phase_i = 2.0 * math.pi * (
        m[:, None, None, None] * u[None, None, :, None] / a
        + n[None, :, None, None] * v[None, None, None, :] / b)
    br = (scale * cv * jnp.cos(phase_i)).reshape(a * b, M)
    bi = (-scale * cv * jnp.sin(phase_i)).reshape(a * b, M)

    if Mp != M:
        ar = jnp.pad(ar, ((0, Mp - M), (0, 0)))
        ai = jnp.pad(ai, ((0, Mp - M), (0, 0)))
        br = jnp.pad(br, ((0, 0), (0, Mp - M)))
        bi = jnp.pad(bi, ((0, 0), (0, Mp - M)))

    a_cat = jnp.concatenate([ar, ai], axis=0).astype(jnp.bfloat16)   # (2Mp, N)
    binv = jnp.concatenate([br, bi], axis=1).astype(jnp.bfloat16)    # (N, 2Mp)
    return a_cat, binv, Mp


def spectral_gating_forward(x, complex_weight, spatial_size=None):
    B, N, C = x.shape
    if spatial_size is None:
        a = b = int(math.sqrt(N))
    else:
        a, b = spatial_size
    assert a * b == N, "token count must equal a*b"
    h, w, dim, _ = complex_weight.shape
    assert (h, w, dim) == (a, b // 2 + 1, C), "weight shape inconsistent with input"

    a_cat, binv, Mp = _dft_operators(a, b)
    M = a * (b // 2 + 1)
    L = B * C

    # Learned gate: (h, w, C, 2) -> (Mp, B*C) in f32, tiled across the folded
    # batch lanes to match x's (N, B*C) layout (index = batch*C + channel).
    wr = complex_weight[..., 0].reshape(M, C).astype(jnp.float32)
    wi = complex_weight[..., 1].reshape(M, C).astype(jnp.float32)
    if Mp != M:
        wr = jnp.pad(wr, ((0, Mp - M), (0, 0)))
        wi = jnp.pad(wi, ((0, Mp - M), (0, 0)))
    wr_bc = jnp.broadcast_to(wr[:, None, :], (Mp, B, C)).reshape(Mp, L)
    wi_bc = jnp.broadcast_to(wi[:, None, :], (Mp, B, C)).reshape(Mp, L)

    # Fold batch into the lane dimension: (B, N, C) -> (N, B*C).
    x2d = jnp.transpose(x, (1, 0, 2)).reshape(N, L)

    # Lane tile: biggest of 512/256/128 dividing B*C, else the full width
    # (full-extent last dim is always a legal block).
    if L % 512 == 0:
        tl = 512
    elif L % 256 == 0:
        tl = 256
    elif L % 128 == 0:
        tl = 128
    else:
        tl = L
    grid = (L // tl,)

    full = lambda i: (0, 0)
    lane = lambda i: (0, i)
    out2d = pl.pallas_call(
        _sgn_kernel,
        out_shape=jax.ShapeDtypeStruct((N, L), jnp.float32),
        grid_spec=pltpu.PrefetchScalarGridSpec(
            num_scalar_prefetch=0,
            grid=grid,
            in_specs=[
                pl.BlockSpec((N, tl), lane),        # x, one lane tile
                pl.BlockSpec((2 * Mp, N), full),    # merged forward operator
                pl.BlockSpec((Mp, tl), lane),       # gate, real part
                pl.BlockSpec((Mp, tl), lane),       # gate, imag part
                pl.BlockSpec((N, 2 * Mp), full),    # merged inverse operator
            ],
            out_specs=pl.BlockSpec((N, tl), lane),
        ),
        compiler_params=pltpu.CompilerParams(
            dimension_semantics=("parallel",)),
    )(x2d, a_cat, wr_bc, wi_bc, binv)

    # Unfold lanes back to (B, N, C); module semantics return float32.
    return jnp.transpose(out2d.reshape(N, B, C), (1, 0, 2))


if __name__ == "__main__":
    key = jax.random.PRNGKey(0)
    kx, kw = jax.random.split(key)

    # Module defaults: h=8, w=5  =>  spatial grid a=b=8, N=64, w = b//2 + 1
    B, C = 2, 32
    h, w = 8, 5
    a = h
    b = 2 * (w - 1)
    N = a * b  # 64, sqrt(N) == a == b

    x = jax.random.normal(kx, (B, N, C), dtype=jnp.float32)
    # deterministic synthetic parameter: torch.randn(h, w, dim, 2) * 0.02
    complex_weight = 0.02 * jax.random.normal(kw, (h, w, C, 2), dtype=jnp.float32)

    out = spectral_gating_forward(x, complex_weight)
    out = jax.block_until_ready(out)

    # Reference (same semantics as torch.fft.rfft2 / irfft2, norm='ortho')
    xg = x.reshape(B, a, b, C).astype(jnp.float32)
    Xf = jnp.fft.rfft2(xg, axes=(1, 2), norm="ortho")
    Wc = complex_weight[..., 0] + 1j * complex_weight[..., 1]
    ref = jnp.fft.irfft2(Xf * Wc, s=(a, b), axes=(1, 2), norm="ortho").reshape(B, N, C)

    assert out.shape == (B, N, C) and out.dtype == jnp.float32
    max_err = float(jnp.max(jnp.abs(out - ref)))
    ref_scale = float(jnp.max(jnp.abs(ref)))
    # bf16 MXU operands (f32 accumulation): loosened but still meaningful bound.
    assert max_err <= 5e-3 + 2e-2 * ref_scale, (
        f"max abs err = {max_err} (ref scale {ref_scale})")
    print("KERNEL_OK")
</pallas_src>

<mosaic_0001>
module attributes {stable_mosaic.version = 11 : i64} {
  func.func @_sgn_kernel(%arg0: i32, %arg1: memref<64x64xf32, #tpu.memory_space<vmem>>, %arg2: memref<80x64xbf16, #tpu.memory_space<vmem>>, %arg3: memref<40x64xf32, #tpu.memory_space<vmem>>, %arg4: memref<40x64xf32, #tpu.memory_space<vmem>>, %arg5: memref<64x80xbf16, #tpu.memory_space<vmem>>, %arg6: memref<64x64xf32, #tpu.memory_space<vmem>>) attributes {dimension_semantics = [#tpu.dimension_semantics<parallel>], iteration_bounds = array<i64: 1>, scalar_prefetch = 0 : i64, scratch_operands = 0 : i64, tpu.core_type = #tpu.core_type<tc>, window_params = [{transform_indices = @transform_0, window_bounds = array<i64: 64, 64>}, {pipeline_mode = #tpu.pipeline_mode<synchronous>, transform_indices = @transform_1, window_bounds = array<i64: 80, 64>}, {transform_indices = @transform_2, window_bounds = array<i64: 40, 64>}, {transform_indices = @transform_3, window_bounds = array<i64: 40, 64>}, {pipeline_mode = #tpu.pipeline_mode<synchronous>, transform_indices = @transform_4, window_bounds = array<i64: 64, 80>}, {transform_indices = @transform_5, window_bounds = array<i64: 64, 64>}]} {
    %c0 = arith.constant 0 : index
    %c0_0 = arith.constant 0 : index
    %0 = vector.load %arg1[%c0, %c0_0] : memref<64x64xf32, #tpu.memory_space<vmem>>, vector<64x64xf32>
    %1 = arith.truncf %0 : vector<64x64xf32> to vector<64x64xbf16>
    %c0_1 = arith.constant 0 : index
    %c0_2 = arith.constant 0 : index
    %2 = vector.load %arg2[%c0_1, %c0_2] : memref<80x64xbf16, #tpu.memory_space<vmem>>, vector<80x64xbf16>
    %cst = arith.constant dense<0.000000e+00> : vector<80x64xf32>
    %3 = tpu.matmul %2, %1, %cst {dimension_numbers = #tpu.dot_dimension_numbers<[1], [0], [0], [1], [0, 0, 1, 1], [], []>} : vector<80x64xbf16>, vector<64x64xbf16>, vector<80x64xf32> -> vector<80x64xf32>
    %4 = vector.extract_strided_slice %3 {offsets = [0, 0], sizes = [40, 64], strides = [1, 1]} : vector<80x64xf32> to vector<40x64xf32>
    %5 = vector.extract_strided_slice %3 {offsets = [40, 0], sizes = [40, 64], strides = [1, 1]} : vector<80x64xf32> to vector<40x64xf32>
    %c0_3 = arith.constant 0 : index
    %c0_4 = arith.constant 0 : index
    %6 = vector.load %arg3[%c0_3, %c0_4] : memref<40x64xf32, #tpu.memory_space<vmem>>, vector<40x64xf32>
    %c0_5 = arith.constant 0 : index
    %c0_6 = arith.constant 0 : index
    %7 = vector.load %arg4[%c0_5, %c0_6] : memref<40x64xf32, #tpu.memory_space<vmem>>, vector<40x64xf32>
    %8 = arith.mulf %4, %6 : vector<40x64xf32>
    %9 = arith.mulf %5, %7 : vector<40x64xf32>
    %10 = arith.subf %8, %9 : vector<40x64xf32>
    %11 = arith.mulf %4, %7 : vector<40x64xf32>
    %12 = arith.mulf %5, %6 : vector<40x64xf32>
    %13 = arith.addf %11, %12 : vector<40x64xf32>
    %14 = tpu.concatenate %10, %13 in 0 : vector<40x64xf32>, vector<40x64xf32> -> vector<80x64xf32>
    %15 = arith.truncf %14 : vector<80x64xf32> to vector<80x64xbf16>
    %c0_7 = arith.constant 0 : index
    %c0_8 = arith.constant 0 : index
    %16 = vector.load %arg5[%c0_7, %c0_8] : memref<64x80xbf16, #tpu.memory_space<vmem>>, vector<64x80xbf16>
    %cst_9 = arith.constant dense<0.000000e+00> : vector<64x64xf32>
    %17 = tpu.matmul %16, %15, %cst_9 {dimension_numbers = #tpu.dot_dimension_numbers<[1], [0], [0], [1], [0, 0, 1, 1], [], []>} : vector<64x80xbf16>, vector<80x64xbf16>, vector<64x64xf32> -> vector<64x64xf32>
    %c0_10 = arith.constant 0 : index
    %c0_11 = arith.constant 0 : index
    %18 = vector.load %arg6[%c0_10, %c0_11] : memref<64x64xf32, #tpu.memory_space<vmem>>, vector<64x64xf32>
    tpu.vector_store %arg6[%c0_10, %c0_11], %17 {strides = array<i32>} : memref<64x64xf32, #tpu.memory_space<vmem>>, vector<64x64xf32>,
    return
  }
  func.func @transform_0(%arg0: i32) -> (i32, i32) {
    %c0_i32 = arith.constant 0 : i32
    %c0_i32_0 = arith.constant 0 : i32
    return %c0_i32, %arg0 : i32, i32
  }
  func.func @transform_1(%arg0: i32) -> (i32, i32) {
    %c0_i32 = arith.constant 0 : i32
    %c0_i32_0 = arith.constant 0 : i32
    %c0_i32_1 = arith.constant 0 : i32
    return %c0_i32, %c0_i32_0 : i32, i32
  }
  func.func @transform_2(%arg0: i32) -> (i32, i32) {
    %c0_i32 = arith.constant 0 : i32
    %c0_i32_0 = arith.constant 0 : i32
    return %c0_i32, %arg0 : i32, i32
  }
  func.func @transform_3(%arg0: i32) -> (i32, i32) {
    %c0_i32 = arith.constant 0 : i32
    %c0_i32_0 = arith.constant 0 : i32
    return %c0_i32, %arg0 : i32, i32
  }
  func.func @transform_4(%arg0: i32) -> (i32, i32) {
    %c0_i32 = arith.constant 0 : i32
    %c0_i32_0 = arith.constant 0 : i32
    %c0_i32_1 = arith.constant 0 : i32
    return %c0_i32, %c0_i32_0 : i32, i32
  }
  func.func @transform_5(%arg0: i32) -> (i32, i32) {
    %c0_i32 = arith.constant 0 : i32
    %c0_i32_0 = arith.constant 0 : i32
    return %c0_i32, %arg0 : i32, i32
  }
}

</mosaic_0001>

<bundles_post_ra>
// kernel: tpu_custom_call.1
= control target key start
LH: loop header
LB: loop body
LE: loop exit
PB: predicated region body
PF: predicated region fallthrough
CT: control target
= control target key end

     0   :  { %10 = vsyncpa [#allocation3], 0  ;;  %s736_s0 = inlined_call_operand.vmem [shape: f32[64,64], index: 0, kind: input, shape index: {}]   ;;  %s737_s1 = inlined_call_operand.vmem [shape: bf16[80,64], index: 1, kind: input, shape index: {}]   ;;  %s738_s2 = inlined_call_operand.hbm [shape: f32[40,64], index: 2, kind: input, shape index: {}]   ;;  %s739_s3 = inlined_call_operand.hbm [shape: f32[40,64], index: 3, kind: input, shape index: {}]   ;;  %s740_s4 = inlined_call_operand.hbm [shape: bf16[64,80], index: 4, kind: input, shape index: {}]   ;;  %s741_s5 = inlined_call_operand.hbm [shape: f32[64,64], index: 5, kind: output, shape index: {}]  }
   0x1   :  { %11 = vsyncpa [#allocation6], 0 }
   0x2   :  { %12 = vsyncpa [#allocation4], 0  ;;  %s571_s18 = smov [#allocation5]   ;;  %s572_s20 = smov [#allocation2]  }
   0x3   :  { %s34_s19 = sshll.u32 %s571_s18, 4  ;;  %s22_s21 = sshll.u32 %s572_s20, 4  ;;  %s35_s19 = int_to_ptr.vmem [resolvable:$true] %s34_s19  ;;  %s611_s21 = int_to_ptr.vmem [resolvable:$true] %s22_s21 }
   0x4   :  { %s477_s24 = scalar_lea.hbm %s739_s3, 640 }
   0x5   :  { %p478_p0 = scmp.ne.s32.totalorder %s739_s3, %s477_s24  ;;  %p481_p1 = scmp.lt.u32.totalorder %s477_s24, %s739_s3 }
   0x7   :  { %p483_p2 = pnand %p481_p1, %p478_p0 }
   0x9   :  { %486 = shalt.err (!%p483_p2)
}
   0xa   :  { %s487_s29 = scalar_lea.vmem %s35_s19, 640  ;;  %p492_p4 = scmp.lt.s32.totalorder %s35_s19, %s35_s19 }
   0xb   :  { %p488_p3 = scmp.ne.s32.totalorder %s35_s19, %s487_s29  ;;  %p493_p5 = scmp.lt.s32.totalorder %s487_s29, %s487_s29 }
   0xd   :  { %p494_p6 = por %p493_p5, %p492_p4 }
   0xf   :  { %p495_p7 = pnand %p494_p6, %p488_p3 }
  0x11   :  { %498 = shalt.err (!%p495_p7)
}
  0x12   :  { %s573_s30 = smov 128   ;;  %s574_s6 = smov 8  }
  0x13   :  { %40 = dma.hbm_to_vmem [thread:$0]  %s739_s3, 640, %s35_s19, [#allocation6], %s573_s30, %s573_s30, %s574_s6  }
  0x14   :  { %s499_s11 = scalar_lea.hbm %s738_s2, 640 }
  0x15   :  { %p500_p8 = scmp.ne.s32.totalorder %s738_s2, %s499_s11  ;;  %p503_p9 = scmp.lt.u32.totalorder %s499_s11, %s738_s2 }
  0x17   :  { %p505_p10 = pnand %p503_p9, %p500_p8 }
  0x19   :  { %508 = shalt.err (!%p505_p10)
}
  0x1a   :  { %s509_s16 = scalar_lea.vmem %s611_s21, 640  ;;  %p514_p12 = scmp.lt.s32.totalorder %s611_s21, %s611_s21 }
  0x1b   :  { %p510_p11 = scmp.ne.s32.totalorder %s611_s21, %s509_s16  ;;  %p515_p13 = scmp.lt.s32.totalorder %s509_s16, %s509_s16 }
  0x1d   :  { %p516_p0 = por %p515_p13, %p514_p12 }
  0x1f   :  { %p517_p1 = pnand %p516_p0, %p510_p11 }
  0x21   :  { %520 = shalt.err (!%p517_p1)
}
  0x22   :  { %28 = dma.hbm_to_vmem [thread:$0]  %s738_s2, 640, %s611_s21, [#allocation3], %s573_s30, %s573_s30, %s574_s6  }
  0x23   :  { %s575_s18 = smov [#allocation7]   ;;  %s521_s23 = scalar_lea.hbm %s740_s4, 512 }
  0x24   :  { %s46_s19 = sshll.u32 %s575_s18, 4  ;;  %p522_p2 = scmp.ne.s32.totalorder %s740_s4, %s521_s23  ;;  %s47_s19 = int_to_ptr.vmem [resolvable:$true] %s46_s19 }
  0x25   :  { %p525_p3 = scmp.lt.u32.totalorder %s521_s23, %s740_s4 }
  0x27   :  { %p527_p4 = pnand %p525_p3, %p522_p2 }
  0x29   :  { %530 = shalt.err (!%p527_p4)
}
  0x2a   :  { %s531_s28 = scalar_lea.vmem %s47_s19, 512  ;;  %p536_p6 = scmp.lt.s32.totalorder %s47_s19, %s47_s19 }
  0x2b   :  { %p532_p5 = scmp.ne.s32.totalorder %s47_s19, %s531_s28  ;;  %p537_p7 = scmp.lt.s32.totalorder %s531_s28, %s531_s28 }
  0x2d   :  { %p538_p8 = por %p537_p7, %p536_p6 }
  0x2f   :  { %p539_p9 = pnand %p538_p8, %p532_p5 }
  0x31   :  { %542 = shalt.err (!%p539_p9)
}
  0x32   :  { %s576_s2 = smov 64   ;;  %s577_s21 = smov 4  }
  0x33   :  { %52 = dma.hbm_to_vmem [thread:$0]  %s740_s4, 512, %s47_s19, [#allocation6], %s576_s2, %s576_s2, %s577_s21  }
  0x34   :  { %565 = dma.done.wait [#allocation3], 640  }
  0x35   :  { %566 = vsyncadd [#allocation3], 4294966656 }
  0x36   :  { %567 = dma.done.wait [#allocation6], 1152  }
  0x37   :  { %568 = vsyncadd [#allocation6], 4294966144  ;;  %v578_v0 = vmov 0.0   ;;  %vm579_vm0 = vmmov 0   ;;  %v63_v1 = vld [vmem:[%s736_s0] sm:$0xff]  ;;  %v64_v2 = vld [vmem:[%s736_s0 + $0x8] sm:$0xff] }
  0x38   :  { %412 = vmatprep.subr.bf16.mxu0 %v578_v0  ;;  %420 = vmatprep.mubr.msk.bf16.mxu0 %vm579_vm0, %v578_v0  ;;  %v65_v3 = vld [vmem:[%s736_s0 + $0x10] sm:$0xff]  ;;  %v71_v4 = vpack.c.bf16 %v64_v2, %v63_v1  ;;  %v66_v5 = vld [vmem:[%s736_s0 + $0x18] sm:$0xff]  ;;  %v67_v7 = vld [vmem:[%s736_s0 + $0x20] sm:$0xff]  ;;  %vm110_vm1 = vcmask 523264   ;;  %vm272_vm2 = vcmask 654336  }
  0x39   :  { %v72_v6 = vpack.c.bf16 %v66_v5, %v65_v3  ;;  %v68_v8 = vld [vmem:[%s736_s0 + $0x28] sm:$0xff]  ;;  %v69_v9 = vld [vmem:[%s736_s0 + $0x30] sm:$0xff]  ;;  %v70_v11 = vld [vmem:[%s736_s0 + $0x38] sm:$0xff] }
  0x3a   :  { %413 = vmatpush3.bf16.msra.mxu0 %v71_v4  ;;  %v73_v10 = vpack.c.bf16 %v68_v8, %v67_v7  ;;  %v74_v12 = vpack.c.bf16 %v70_v11, %v69_v9  ;;  %v468_v13 = vld [vmem:[%s737_s1] sm:$0xff]   ;;  %v469_v14 = vld [vmem:[%s737_s1 + $0x8] sm:$0xff]   ;;  %v470_v15 = vld [vmem:[%s737_s1 + $0x10] sm:$0xff]  }
  0x3b   :  { %414 = vmatprep.subr.bf16.mxu0 %v578_v0  ;;  %v471_v16 = vld [vmem:[%s737_s1 + $0x18] sm:$0xff]   ;;  %v472_v17 = vld [vmem:[%s737_s1 + $0x20] sm:$0xff]   ;;  %v473_v18 = vld [vmem:[#allocation7] sm:$0xff]   ;;  %s580_s1 = smov [#allocation8]  }
  0x3c   :  { %450 = vmatprep.mubr.msk.bf16.mxu1 %vm272_vm2, %v473_v18  ;;  %v199_v27 = vld [vmem:[#allocation2] sm:$0xff]  ;;  %v204_v28 = vld [vmem:[#allocation5] sm:$0xff]  ;;  %v205_v40 = vld [vmem:[#allocation5 + $0x8] sm:$0xff]  ;;  %s363_s7 = sshll.u32 %s580_s1, 4  ;;  %s364_s7 = int_to_ptr.vmem [resolvable:$true] %s363_s7 }
  0x3d   :  { %v200_v39 = vld [vmem:[#allocation2 + $0x8] sm:$0xff]  ;;  %v201_v41 = vld [vmem:[#allocation2 + $0x10] sm:$0xff]  ;;  %v206_v42 = vld [vmem:[#allocation5 + $0x10] sm:$0xff]  ;;  %s543_s8 = scalar_lea.vmem %s364_s7, 1024  ;;  %p548_p11 = scmp.lt.s32.totalorder %s364_s7, %s364_s7 }
  0x3e   :  { %415 = vmatpush3.bf16.msra.mxu0 %v72_v6  ;;  %v202_v60 = vld [vmem:[#allocation2 + $0x18] sm:$0xff]  ;;  %v207_v61 = vld [vmem:[#allocation5 + $0x18] sm:$0xff]  ;;  %v208_v63 = vld [vmem:[#allocation5 + $0x20] sm:$0xff]  ;;  %p544_p10 = scmp.ne.s32.totalorder %s364_s7, %s543_s8  ;;  %p549_p12 = scmp.lt.s32.totalorder %s543_s8, %s543_s8 }
  0x3f   :  { %416 = vmatprep.subr.bf16.mxu0 %v578_v0  ;;  %v203_v62 = vld [vmem:[#allocation2 + $0x20] sm:$0xff] }
  0x40   :  { %p550_p13 = por %p549_p12, %p548_p11 }
  0x42   :  { %417 = vmatpush3.bf16.msra.mxu0 %v73_v10  ;;  %p551_p0 = pnand %p550_p13, %p544_p10 }
  0x43   :  { %418 = vmatprep.subr.bf16.mxu0 %v578_v0 }
  0x46   :  { %419 = vmatpush3.bf16.msra.mxu0 %v74_v12 }
  0x49   :  { %421 = vmatmul.mubr.msk.bf16.vlgmr.msra.gmra.mrb[0].mxu0 %vm110_vm1, %v468_v13 }
  0x4a   :  { %424 = vmatprep.mubr.msk.bf16.mxu0 %vm579_vm0, %v578_v0 }
  0x51   :  { %425 = vmatmul.mubr.msk.bf16.gmra.mrb[4].mxu0 %vm110_vm1, %v469_v14 }
  0x52   :  { %428 = vmatprep.mubr.msk.bf16.mxu0 %vm579_vm0, %v578_v0 }
  0x59   :  { %429 = vmatmul.mubr.msk.bf16.gmra.mrb[8].mxu0 %vm110_vm1, %v470_v15 }
  0x5a   :  { %432 = vmatprep.mubr.msk.bf16.mxu0 %vm579_vm0, %v578_v0 }
  0x61   :  { %433 = vmatmul.mubr.msk.bf16.gmra.mrb[12].mxu0 %vm110_vm1, %v471_v16 }
  0x62   :  { %436 = vmatprep.mubr.msk.bf16.mxu0 %vm579_vm0, %v578_v0 }
  0x69   :  { %437 = vmatmul.mubr.msk.bf16.gmra.mrb[16].mxu0 %vm110_vm1, %v472_v17 }
 0x11c   :  { %v160_v19 = vpop.f32.mrb[0].mxu0 }
 0x11d   :  { %v422_v20 = vpop.f32.mrb[1].mxu0  ;;  %v209_v32 = vmul.f32 %v199_v27, %v160_v19  ;;  %v224_v33 = vmul.f32 %v204_v28, %v160_v19 }
 0x11e   :  { %v163_v21 = vpop.f32.mrb[2].mxu0  ;;  %v474_v20 = vld [vmem:[#allocation7 + $0x8] sm:$0xff]  }
 0x11f   :  { %v423_v22 = vpop.f32.mrb[3].mxu0  ;;  %v210_v44 = vmul.f32 %v200_v39, %v163_v21  ;;  %v225_v45 = vmul.f32 %v205_v40, %v163_v21  ;;  %v475_v21 = vld [vmem:[#allocation7 + $0x10] sm:$0xff]  }
 0x120   :  { %v476_v22 = vld [vmem:[#allocation7 + $0x18] sm:$0xff]  }
 0x124   :  { %v168_v23 = vpop.f32.mrb[4].mxu0 }
 0x125   :  { %v426_v24 = vpop.f32.mrb[5].mxu0  ;;  %v211_v49 = vmul.f32 %v201_v41, %v168_v23  ;;  %v226_v50 = vmul.f32 %v206_v42, %v168_v23 }
 0x126   :  { %v171_v25 = vpop.f32.mrb[6].mxu0 }
 0x127   :  { %v427_v26 = vpop.f32.mrb[7].mxu0  ;;  %v212_v2 = vmul.f32 %v202_v60, %v171_v25  ;;  %v227_v3 = vmul.f32 %v207_v61, %v171_v25 }
 0x12c   :  { %v176_v29 = vpop.f32.mrb[8].mxu0 }
 0x12d   :  { %v430_v30 = vpop.f32.mrb[9].mxu0  ;;  %v213_v7 = vmul.f32 %v203_v62, %v176_v29  ;;  %v228_v8 = vmul.f32 %v208_v63, %v176_v29 }
 0x12e   :  { %v179_v31 = vpop.f32.mrb[10].mxu0 }
 0x12f   :  { %v214_v34 = vmul.f32 %v204_v28, %v179_v31  ;;  %v229_v35 = vmul.f32 %v199_v27, %v179_v31  ;;  %v431_v36 = vpop.f32.mrb[11].mxu0 }
 0x131   :  { %v234_v37 = vadd.f32 %v229_v35, %v224_v33  ;;  %v219_v38 = vsub.f32 %v209_v32, %v214_v34 }
 0x134   :  { %v184_v43 = vpop.f32.mrb[12].mxu0 }
 0x135   :  { %v215_v46 = vmul.f32 %v205_v40, %v184_v43  ;;  %v230_v47 = vmul.f32 %v200_v39, %v184_v43  ;;  %v434_v48 = vpop.f32.mrb[13].mxu0 }
 0x136   :  { %v187_v51 = vpop.f32.mrb[14].mxu0 }
 0x137   :  { %v235_v52 = vadd.f32 %v230_v47, %v225_v45  ;;  %v216_v53 = vmul.f32 %v206_v42, %v187_v51  ;;  %v231_v54 = vmul.f32 %v201_v41, %v187_v51  ;;  %v435_v55 = vpop.f32.mrb[15].mxu0  ;;  %v220_v56 = vsub.f32 %v210_v44, %v215_v46 }
 0x139   :  { %v221_v57 = vsub.f32 %v211_v49, %v216_v53  ;;  %v236_v58 = vadd.f32 %v231_v54, %v226_v50  ;;  %v239_v59 = vpack.c.bf16 %v220_v56, %v219_v38 }
 0x13b   :  { %440 = vmatprep.subr.bf16.mxu1 %v239_v59  ;;  %v242_v0 = vpack.c.bf16 %v236_v58, %v235_v52 }
 0x13c   :  { %v192_v1 = vpop.f32.mrb[16].mxu0  ;;  %441 = vmatpush3.bf16.msra.mxu1 %v239_v59 }
 0x13d   :  { %v217_v4 = vmul.f32 %v207_v61, %v192_v1  ;;  %v232_v5 = vmul.f32 %v202_v60, %v192_v1  ;;  %v438_v6 = vpop.f32.mrb[17].mxu0 }
 0x13e   :  { %v195_v9 = vpop.f32.mrb[18].mxu0 }
 0x13f   :  { %v222_v10 = vsub.f32 %v212_v2, %v217_v4  ;;  %v237_v11 = vadd.f32 %v232_v5, %v227_v3  ;;  %v218_v12 = vmul.f32 %v208_v63, %v195_v9  ;;  %v233_v13 = vmul.f32 %v203_v62, %v195_v9  ;;  %v439_v14 = vpop.f32.mrb[19].mxu0 }
 0x141   :  { %v223_v15 = vsub.f32 %v213_v7, %v218_v12  ;;  %v238_v16 = vadd.f32 %v233_v13, %v228_v8  ;;  %v240_v17 = vpack.c.bf16 %v222_v10, %v221_v57 }
 0x143   :  { %442 = vmatprep.subr.bf16.mxu1 %v240_v17  ;;  %v241_v18 = vpack.c.bf16 %v234_v37, %v223_v15  ;;  %v243_v19 = vpack.c.bf16 %v238_v16, %v237_v11 }
 0x144   :  { %443 = vmatpush3.bf16.msra.mxu1 %v240_v17 }
 0x145   :  { %444 = vmatprep.subr.bf16.mxu1 %v241_v18 }
 0x148   :  { %445 = vmatpush3.bf16.msra.mxu1 %v241_v18 }
 0x149   :  { %446 = vmatprep.subr.bf16.mxu1 %v242_v0 }
 0x14c   :  { %447 = vmatpush3.bf16.msra.mxu1 %v242_v0 }
 0x14d   :  { %448 = vmatprep.subr.bf16.mxu1 %v243_v19 }
 0x150   :  { %449 = vmatpush3.bf16.msra.mxu1 %v243_v19 }
 0x153   :  { %451 = vmatmul.mubr.msk.bf16.vlgmr.msra.gmra.mrb[0].mxu1 %vm272_vm2, %v474_v20 }
 0x154   :  { %454 = vmatprep.mubr.msk.bf16.mxu1 %vm272_vm2, %v475_v21 }
 0x15b   :  { %455 = vmatmul.mubr.msk.bf16.gmra.mrb[4].mxu1 %vm272_vm2, %v476_v22 }
 0x226   :  { %v452_v23 = vpop.f32.mrb[0].mxu1 }
 0x227   :  { %352 = vst.msk [vmem:[#allocation8 + $0x10] sm:$0xff] %vm110_vm1, %v452_v23  ;;  %v319_v24 = vpop.f32.mrb[1].mxu1 }
 0x228   :  { %350 = vst.msk [vmem:[#allocation8] sm:$0xff] %vm110_vm1, %v319_v24  ;;  %v453_v25 = vpop.f32.mrb[2].mxu1 }
 0x229   :  { %353 = vst.msk [vmem:[#allocation8 + $0x18] sm:$0xff] %vm110_vm1, %v453_v25  ;;  %v322_v26 = vpop.f32.mrb[3].mxu1 }
 0x22a   :  { %351 = vst.msk [vmem:[#allocation8 + $0x8] sm:$0xff] %vm110_vm1, %v322_v26 }
 0x22e   :  { %v456_v27 = vpop.f32.mrb[4].mxu1 }
 0x22f   :  { %356 = vst.msk [vmem:[#allocation8 + $0x30] sm:$0xff] %vm110_vm1, %v456_v27  ;;  %v335_v28 = vpop.f32.mrb[5].mxu1 }
 0x230   :  { %354 = vst.msk [vmem:[#allocation8 + $0x20] sm:$0xff] %vm110_vm1, %v335_v28  ;;  %v457_v29 = vpop.f32.mrb[6].mxu1 }
 0x231   :  { %357 = vst.msk [vmem:[#allocation8 + $0x38] sm:$0xff] %vm110_vm1, %v457_v29  ;;  %v338_v30 = vpop.f32.mrb[7].mxu1 }
 0x232   :  { %355 = vst.msk [vmem:[#allocation8 + $0x28] sm:$0xff] %vm110_vm1, %v338_v30 }
 0x233   :  { %554 = shalt.err (!%p551_p0)
}
 0x234   :  { %s555_s11 = scalar_lea.hbm %s741_s5, 1024 }
 0x235   :  { %p556_p1 = scmp.ne.s32.totalorder %s741_s5, %s555_s11  ;;  %p559_p2 = scmp.lt.u32.totalorder %s555_s11, %s741_s5 }
 0x237   :  { %p561_p3 = pnand %p559_p2, %p556_p1 }
 0x239   :  { %564 = shalt.err (!%p561_p3)
}
 0x23a   :  { %369 = dma.vmem_to_hbm [thread:$0]  %s364_s7, 1024, %s741_s5, [#allocation4], %s573_s30, %s573_s30, %s574_s6  }
 0x23b   :  { %569 = dma.done.wait [#allocation4], 1024  }
 0x23c   :  { %570 = vsyncadd [#allocation4], 4294966272 }
 0x23d   :  { %373 = vsyncpa [#allocation3], 1 }
 0x23e   :  { %374 = vsyncpa [#allocation6], 1 }
 0x23f   :  { %375 = vsyncpa [#allocation4], 1 }

</bundles_post_ra>
